<compile_context>
chip_gen: v5e
topology: v5e:2x2
jax: 0.10.0
libtpu: 0.0.40
codegen_flags: <defaults>
</compile_context>

<pallas_src>
import jax
import jax.numpy as jnp
from jax.experimental import pallas as pl
from jax.experimental.pallas import tpu as pltpu

LANE = 128     # fast (lane) axis width of a vreg
SUBLANE = 8    # slow (sublane) axis width of a vreg


def _round_up(x, m):
    return ((x + m - 1) // m) * m


def _mlp_kernel(x_ref, w1_ref, b1_ref, w2_ref, b2_ref, w3_ref, b3_ref, o_ref):
    x = x_ref[...]

    # linear1 + sigmoid  (f32 accumulate on the MXU, bias/sigmoid on VPU/EUP)
    h1 = jnp.dot(x, w1_ref[...], preferred_element_type=jnp.float32) + b1_ref[...]
    h1 = jax.nn.sigmoid(h1)

    # hidden + sigmoid
    h2 = jnp.dot(h1, w2_ref[...], preferred_element_type=jnp.float32) + b2_ref[...]
    h2 = jax.nn.sigmoid(h2)

    # linear2 (no activation)
    out = jnp.dot(h2, w3_ref[...], preferred_element_type=jnp.float32) + b3_ref[...]
    o_ref[...] = out.astype(o_ref.dtype)


def prepare_params(params):
    """One-time glue, run OUTSIDE the per-call hot path.

    - Transpose PyTorch-convention (out, in) weights to (in, out) so the kernel
      hot path is plain `x @ W + b` on the MXU.
    - Zero-pad feature dims up to multiples of 128 so matmuls and the output
      store are lane-dense. Padding preserves the first F output columns
      exactly (padded columns feed only zero-padded weight rows).
    """
    F = params["w1"].shape[0]           # num_feature
    H = params["w2"].shape[0]           # 4 * num_feature
    Fp = _round_up(F, LANE)
    Hp = _round_up(H, LANE)

    def pad2(a, rows, cols):
        return jnp.pad(a, ((0, rows - a.shape[0]), (0, cols - a.shape[1])))

    def pad1(a, cols):
        return jnp.pad(a, ((0, cols - a.shape[0]),)).reshape(1, cols)

    return {
        "w1": pad2(params["w1"].T, Fp, Fp), "b1": pad1(params["b1"], Fp),
        "w2": pad2(params["w2"].T, Fp, Hp), "b2": pad1(params["b2"], Hp),
        "w3": pad2(params["w3"].T, Hp, Fp), "b3": pad1(params["b3"], Fp),
        "F": F, "F_pad": Fp, "H_pad": Hp,
    }


def linear_attack_model(x, prep, *, tile_b=512):
    """Forward pass. x: (B, F) f32; prep: output of prepare_params."""
    B, F = x.shape
    assert F == prep["F"], "feature dim mismatch with prepared params"
    Fp, Hp = prep["F_pad"], prep["H_pad"]

    # Batch tile: biggest multiple of 8 up to tile_b (sublane-aligned).
    tb = min(_round_up(B, SUBLANE), _round_up(tile_b, SUBLANE))
    Bp = _round_up(B, tb)
    n_tiles = Bp // tb

    xp = x
    if Bp != B or Fp != F:
        xp = jnp.pad(x, ((0, Bp - B), (0, Fp - F)))

    def const(shape):
        # Weights / biases: same block every grid step -> stay VMEM-resident.
        return pl.BlockSpec(shape, lambda i: (0, 0))

    bytes_per = jnp.dtype(jnp.float32).itemsize
    cost = pl.CostEstimate(
        flops=2 * Bp * (Fp * Fp + Fp * Hp + Hp * Fp),
        transcendentals=Bp * (Fp + Hp),                      # two sigmoids
        bytes_accessed=bytes_per * (2 * Bp * Fp              # x in, out
                                    + Fp * Fp + Fp * Hp + Hp * Fp  # weights
                                    + 2 * Fp + Hp),          # biases
    )

    out = pl.pallas_call(
        _mlp_kernel,
        out_shape=jax.ShapeDtypeStruct((Bp, Fp), x.dtype),
        grid_spec=pl.GridSpec(
            grid=(n_tiles,),
            in_specs=[
                pl.BlockSpec((tb, Fp), lambda i: (i, 0)),   # x tile
                const((Fp, Fp)), const((1, Fp)),            # w1, b1
                const((Fp, Hp)), const((1, Hp)),            # w2, b2
                const((Hp, Fp)), const((1, Fp)),            # w3, b3
            ],
            out_specs=pl.BlockSpec((tb, Fp), lambda i: (i, 0)),
        ),
        compiler_params=pltpu.CompilerParams(
            # Batch tiles are independent -> shard the grid across TCs (v7x).
            dimension_semantics=("parallel",),
        ),
        cost_estimate=cost,
    )(xp, prep["w1"], prep["b1"], prep["w2"], prep["b2"], prep["w3"], prep["b3"])

    return out[:B, :F]


def _init_params(key, num_feature):
    """Deterministic init mimicking nn.Linear's U(-1/sqrt(in), 1/sqrt(in))."""
    ks = jax.random.split(key, 6)
    F = num_feature

    def lin(kw, kb, out_f, in_f):
        bound = 1.0 / jnp.sqrt(in_f)
        w = jax.random.uniform(kw, (out_f, in_f), jnp.float32, -bound, bound)
        b = jax.random.uniform(kb, (out_f,), jnp.float32, -bound, bound)
        return w, b

    w1, b1 = lin(ks[0], ks[1], F, F)        # linear1: F -> F
    w2, b2 = lin(ks[2], ks[3], 4 * F, F)    # hidden:  F -> 4F
    w3, b3 = lin(ks[4], ks[5], F, 4 * F)    # linear2: 4F -> F
    return {"w1": w1, "b1": b1, "w2": w2, "b2": b2, "w3": w3, "b3": b3}


def _reference(x, params):
    h1 = jax.nn.sigmoid(x @ params["w1"].T + params["b1"])
    h2 = jax.nn.sigmoid(h1 @ params["w2"].T + params["b2"])
    return h2 @ params["w3"].T + params["b3"]


if __name__ == "__main__":
    key = jax.random.PRNGKey(0)
    k_x, k_x2, k_p = jax.random.split(key, 3)

    num_feature = 32
    params = _init_params(k_p, num_feature)
    prep = prepare_params(params)          # transpose + pad ONCE

    # Small case (matches the PyTorch module's typical toy usage).
    batch = 8
    x = jax.random.normal(k_x, (batch, num_feature), dtype=jnp.float32)
    out = linear_attack_model(x, prep)
    jax.block_until_ready(out)
    ref = _reference(x, params)
    assert out.shape == (batch, num_feature)
    assert jnp.allclose(out, ref, atol=1e-5, rtol=1e-5)

    # Non-aligned batch to exercise batch tiling + padding path.
    batch2 = 260
    x2 = jax.random.normal(k_x2, (batch2, num_feature), dtype=jnp.float32)
    out2 = linear_attack_model(x2, prep, tile_b=128)
    jax.block_until_ready(out2)
    ref2 = _reference(x2, params)
    assert out2.shape == (batch2, num_feature)
    assert jnp.allclose(out2, ref2, atol=1e-5, rtol=1e-5)

    print("KERNEL_OK")
</pallas_src>

<mosaic_0001>
module attributes {stable_mosaic.version = 11 : i64} {
  func.func @_mlp_kernel(%arg0: i32, %arg1: memref<8x128xf32, #tpu.memory_space<vmem>>, %arg2: memref<128x128xf32, #tpu.memory_space<vmem>>, %arg3: memref<1x128xf32, #tpu.memory_space<vmem>>, %arg4: memref<128x128xf32, #tpu.memory_space<vmem>>, %arg5: memref<1x128xf32, #tpu.memory_space<vmem>>, %arg6: memref<128x128xf32, #tpu.memory_space<vmem>>, %arg7: memref<1x128xf32, #tpu.memory_space<vmem>>, %arg8: memref<8x128xf32, #tpu.memory_space<vmem>>) attributes {dimension_semantics = [#tpu.dimension_semantics<parallel>], iteration_bounds = array<i64: 1>, scalar_prefetch = 0 : i64, scratch_operands = 0 : i64, tpu.core_type = #tpu.core_type<tc>, window_params = [{transform_indices = @transform_0, window_bounds = array<i64: 8, 128>}, {pipeline_mode = #tpu.pipeline_mode<synchronous>, transform_indices = @transform_1, window_bounds = array<i64: 128, 128>}, {pipeline_mode = #tpu.pipeline_mode<synchronous>, transform_indices = @transform_2, window_bounds = array<i64: 1, 128>}, {pipeline_mode = #tpu.pipeline_mode<synchronous>, transform_indices = @transform_3, window_bounds = array<i64: 128, 128>}, {pipeline_mode = #tpu.pipeline_mode<synchronous>, transform_indices = @transform_4, window_bounds = array<i64: 1, 128>}, {pipeline_mode = #tpu.pipeline_mode<synchronous>, transform_indices = @transform_5, window_bounds = array<i64: 128, 128>}, {pipeline_mode = #tpu.pipeline_mode<synchronous>, transform_indices = @transform_6, window_bounds = array<i64: 1, 128>}, {transform_indices = @transform_7, window_bounds = array<i64: 8, 128>}]} {
    %c0 = arith.constant 0 : index
    %c0_0 = arith.constant 0 : index
    %0 = vector.load %arg1[%c0, %c0_0] : memref<8x128xf32, #tpu.memory_space<vmem>>, vector<8x128xf32>
    %c0_1 = arith.constant 0 : index
    %c0_2 = arith.constant 0 : index
    %1 = vector.load %arg2[%c0_1, %c0_2] : memref<128x128xf32, #tpu.memory_space<vmem>>, vector<128x128xf32>
    %cst = arith.constant dense<0.000000e+00> : vector<8x128xf32>
    %2 = tpu.matmul %0, %1, %cst {dimension_numbers = #tpu.dot_dimension_numbers<[1], [0], [0], [1], [0, 0, 1, 1], [], []>} : vector<8x128xf32>, vector<128x128xf32>, vector<8x128xf32> -> vector<8x128xf32>
    %c0_3 = arith.constant 0 : index
    %c0_4 = arith.constant 0 : index
    %3 = vector.load %arg3[%c0_3, %c0_4] : memref<1x128xf32, #tpu.memory_space<vmem>>, vector<1x128xf32>
    %4 = vector.broadcast %3 : vector<1x128xf32> to vector<8x128xf32>
    %5 = arith.addf %2, %4 : vector<8x128xf32>
    %6 = arith.negf %5 : vector<8x128xf32>
    %7 = math.exp %6 : vector<8x128xf32>
    %cst_5 = arith.constant 1.000000e+00 : f32
    %8 = vector.broadcast %cst_5 : f32 to vector<8x128xf32>
    %9 = arith.addf %8, %7 : vector<8x128xf32>
    %10 = arith.divf %8, %9 : vector<8x128xf32>
    %c0_6 = arith.constant 0 : index
    %c0_7 = arith.constant 0 : index
    %11 = vector.load %arg4[%c0_6, %c0_7] : memref<128x128xf32, #tpu.memory_space<vmem>>, vector<128x128xf32>
    %cst_8 = arith.constant dense<0.000000e+00> : vector<8x128xf32>
    %12 = tpu.matmul %10, %11, %cst_8 {dimension_numbers = #tpu.dot_dimension_numbers<[1], [0], [0], [1], [0, 0, 1, 1], [], []>} : vector<8x128xf32>, vector<128x128xf32>, vector<8x128xf32> -> vector<8x128xf32>
    %c0_9 = arith.constant 0 : index
    %c0_10 = arith.constant 0 : index
    %13 = vector.load %arg5[%c0_9, %c0_10] : memref<1x128xf32, #tpu.memory_space<vmem>>, vector<1x128xf32>
    %14 = vector.broadcast %13 : vector<1x128xf32> to vector<8x128xf32>
    %15 = arith.addf %12, %14 : vector<8x128xf32>
    %16 = arith.negf %15 : vector<8x128xf32>
    %17 = math.exp %16 : vector<8x128xf32>
    %cst_11 = arith.constant 1.000000e+00 : f32
    %18 = vector.broadcast %cst_11 : f32 to vector<8x128xf32>
    %19 = arith.addf %18, %17 : vector<8x128xf32>
    %20 = arith.divf %18, %19 : vector<8x128xf32>
    %c0_12 = arith.constant 0 : index
    %c0_13 = arith.constant 0 : index
    %21 = vector.load %arg6[%c0_12, %c0_13] : memref<128x128xf32, #tpu.memory_space<vmem>>, vector<128x128xf32>
    %cst_14 = arith.constant dense<0.000000e+00> : vector<8x128xf32>
    %22 = tpu.matmul %20, %21, %cst_14 {dimension_numbers = #tpu.dot_dimension_numbers<[1], [0], [0], [1], [0, 0, 1, 1], [], []>} : vector<8x128xf32>, vector<128x128xf32>, vector<8x128xf32> -> vector<8x128xf32>
    %c0_15 = arith.constant 0 : index
    %c0_16 = arith.constant 0 : index
    %23 = vector.load %arg7[%c0_15, %c0_16] : memref<1x128xf32, #tpu.memory_space<vmem>>, vector<1x128xf32>
    %24 = vector.broadcast %23 : vector<1x128xf32> to vector<8x128xf32>
    %25 = arith.addf %22, %24 : vector<8x128xf32>
    %c0_17 = arith.constant 0 : index
    %c0_18 = arith.constant 0 : index
    %26 = vector.load %arg8[%c0_17, %c0_18] : memref<8x128xf32, #tpu.memory_space<vmem>>, vector<8x128xf32>
    tpu.vector_store %arg8[%c0_17, %c0_18], %25 {strides = array<i32>} : memref<8x128xf32, #tpu.memory_space<vmem>>, vector<8x128xf32>,
    return
  }
  func.func @transform_0(%arg0: i32) -> (i32, i32) {
    %c0_i32 = arith.constant 0 : i32
    %c0_i32_0 = arith.constant 0 : i32
    return %arg0, %c0_i32 : i32, i32
  }
  func.func @transform_1(%arg0: i32) -> (i32, i32) {
    %c0_i32 = arith.constant 0 : i32
    %c0_i32_0 = arith.constant 0 : i32
    %c0_i32_1 = arith.constant 0 : i32
    return %c0_i32, %c0_i32_0 : i32, i32
  }
  func.func @transform_2(%arg0: i32) -> (i32, i32) {
    %c0_i32 = arith.constant 0 : i32
    %c0_i32_0 = arith.constant 0 : i32
    %c0_i32_1 = arith.constant 0 : i32
    return %c0_i32, %c0_i32_0 : i32, i32
  }
  func.func @transform_3(%arg0: i32) -> (i32, i32) {
    %c0_i32 = arith.constant 0 : i32
    %c0_i32_0 = arith.constant 0 : i32
    %c0_i32_1 = arith.constant 0 : i32
    return %c0_i32, %c0_i32_0 : i32, i32
  }
  func.func @transform_4(%arg0: i32) -> (i32, i32) {
    %c0_i32 = arith.constant 0 : i32
    %c0_i32_0 = arith.constant 0 : i32
    %c0_i32_1 = arith.constant 0 : i32
    return %c0_i32, %c0_i32_0 : i32, i32
  }
  func.func @transform_5(%arg0: i32) -> (i32, i32) {
    %c0_i32 = arith.constant 0 : i32
    %c0_i32_0 = arith.constant 0 : i32
    %c0_i32_1 = arith.constant 0 : i32
    return %c0_i32, %c0_i32_0 : i32, i32
  }
  func.func @transform_6(%arg0: i32) -> (i32, i32) {
    %c0_i32 = arith.constant 0 : i32
    %c0_i32_0 = arith.constant 0 : i32
    %c0_i32_1 = arith.constant 0 : i32
    return %c0_i32, %c0_i32_0 : i32, i32
  }
  func.func @transform_7(%arg0: i32) -> (i32, i32) {
    %c0_i32 = arith.constant 0 : i32
    %c0_i32_0 = arith.constant 0 : i32
    return %arg0, %c0_i32 : i32, i32
  }
}

</mosaic_0001>

<bundles_post_ra>
// kernel: tpu_custom_call.1
= control target key start
LH: loop header
LB: loop body
LE: loop exit
PB: predicated region body
PF: predicated region fallthrough
CT: control target
= control target key end

     0   :  { %12 = vsyncpa [#allocation3], 0  ;;  %s486_s0 = inlined_call_operand.hbm [shape: f32[8,128], index: 0, kind: input, shape index: {}]   ;;  %s487_s1 = inlined_call_operand.hbm [shape: f32[128,128], index: 1, kind: input, shape index: {}]   ;;  %s488_s2 = inlined_call_operand.vmem [shape: f32[1,128], index: 2, kind: input, shape index: {}]   ;;  %s489_s3 = inlined_call_operand.hbm [shape: f32[128,128], index: 3, kind: input, shape index: {}]   ;;  %s490_s4 = inlined_call_operand.vmem [shape: f32[1,128], index: 4, kind: input, shape index: {}]   ;;  %s491_s5 = inlined_call_operand.hbm [shape: f32[128,128], index: 5, kind: input, shape index: {}]   ;;  %s492_s6 = inlined_call_operand.vmem [shape: f32[1,128], index: 6, kind: input, shape index: {}]   ;;  %s493_s7 = inlined_call_operand.hbm [shape: f32[8,128], index: 7, kind: output, shape index: {}]  }
   0x1   :  { %13 = vsyncpa [#allocation6], 0 }
   0x2   :  { %14 = vsyncpa [#allocation9], 0  ;;  %s31_s26 = sshll.u32 %s487_s1, 4  ;;  %s32_s26 = int_to_ptr.hbm [resolvable:$true] %s31_s26 }
   0x3   :  { %15 = vsyncpa [#allocation4], 0  ;;  %s415_s27 = smov [#allocation5]   ;;  %s21_s8 = sshll.u32 %s486_s0, 4  ;;  %s22_s8 = int_to_ptr.hbm [resolvable:$true] %s21_s8 }
   0x4   :  { %s33_s28 = sshll.u32 %s415_s27, 4  ;;  %s416_s9 = smov 128   ;;  %s34_s28 = int_to_ptr.vmem [resolvable:$true] %s33_s28 }
   0x5   :  { %s417_s10 = smov 8   ;;  %s418_s11 = smov [#allocation2]  }
   0x6   :  { %39 = dma.hbm_to_vmem [thread:$0]  %s32_s26, 2048, %s34_s28, [#allocation6], %s416_s9, %s416_s9, %s417_s10  }
   0x7   :  { %s23_s12 = sshll.u32 %s418_s11, 4  ;;  %s46_s15 = sshll.u32 %s489_s3, 4  ;;  %s24_s12 = int_to_ptr.vmem [resolvable:$true] %s23_s12  ;;  %s47_s15 = int_to_ptr.hbm [resolvable:$true] %s46_s15 }
   0x8   :  { %26 = dma.hbm_to_vmem [thread:$0]  %s22_s8, 128, %s24_s12, [#allocation3]  }
   0x9   :  { %s61_s17 = sshll.u32 %s491_s5, 4  ;;  %s419_s18 = smov [#allocation7]   ;;  %s62_s17 = int_to_ptr.hbm [resolvable:$true] %s61_s17 }
   0xa   :  { %s48_s19 = sshll.u32 %s419_s18, 4  ;;  %s420_s0 = smov [#allocation8]   ;;  %s49_s19 = int_to_ptr.vmem [resolvable:$true] %s48_s19 }
   0xb   :  { %54 = dma.hbm_to_vmem [thread:$0]  %s47_s15, 2048, %s49_s19, [#allocation6], %s416_s9, %s416_s9, %s417_s10  }
   0xc   :  { %s63_s20 = sshll.u32 %s420_s0, 4  ;;  %s64_s20 = int_to_ptr.vmem [resolvable:$true] %s63_s20 }
   0xd   :  { %69 = dma.hbm_to_vmem [thread:$0]  %s62_s17, 2048, %s64_s20, [#allocation9], %s416_s9, %s416_s9, %s417_s10  }
   0xe   :  { %407 = dma.done.wait [#allocation3], 128  }
   0xf   :  { %408 = vsyncadd [#allocation3], 4294967168 }
  0x10   :  { %409 = dma.done.wait [#allocation6], 4096  }
  0x11   :  { %410 = vsyncadd [#allocation6], 4294963200 }
  0x12   :  { %411 = dma.done.wait [#allocation9], 2048  }
  0x13   :  { %412 = vsyncadd [#allocation9], 4294965248  ;;  %v104_v0 = vld [vmem:[#allocation5 + $0x78] sm:$0xff]  ;;  %v103_v1 = vld [vmem:[#allocation5 + $0x70] sm:$0xff]  ;;  %s421_s23 = smov [#allocation10]   ;;  %s255_s27 = sshll.u32 %s493_s7, 4  ;;  %s256_s27 = int_to_ptr.hbm [resolvable:$true] %s255_s27 }
  0x14   :  { %109 = vmatpush.msra.mxu0 %v104_v0  ;;  %v102_v2 = vld [vmem:[#allocation5 + $0x68] sm:$0xff]  ;;  %v101_v3 = vld [vmem:[#allocation5 + $0x60] sm:$0xff]  ;;  %v100_v4 = vld [vmem:[#allocation5 + $0x58] sm:$0xff]  ;;  %s253_s24 = sshll.u32 %s421_s23, 4  ;;  %s254_s24 = int_to_ptr.vmem [resolvable:$true] %s253_s24 }
  0x15   :  { %v99_v5 = vld [vmem:[#allocation5 + $0x50] sm:$0xff]  ;;  %v98_v6 = vld [vmem:[#allocation5 + $0x48] sm:$0xff]  ;;  %v97_v7 = vld [vmem:[#allocation5 + $0x40] sm:$0xff] }
  0x16   :  { %110 = vmatpush.msra.mxu0 %v103_v1  ;;  %v96_v8 = vld [vmem:[#allocation5 + $0x38] sm:$0xff]  ;;  %v95_v9 = vld [vmem:[#allocation5 + $0x30] sm:$0xff]  ;;  %v94_v10 = vld [vmem:[#allocation5 + $0x28] sm:$0xff] }
  0x17   :  { %v93_v11 = vld [vmem:[#allocation5 + $0x20] sm:$0xff]  ;;  %v92_v12 = vld [vmem:[#allocation5 + $0x18] sm:$0xff]  ;;  %v91_v13 = vld [vmem:[#allocation5 + $0x10] sm:$0xff] }
  0x18   :  { %111 = vmatpush.msra.mxu0 %v102_v2  ;;  %v90_v14 = vld [vmem:[#allocation5 + $0x8] sm:$0xff]  ;;  %v89_v15 = vld [vmem:[#allocation5] sm:$0xff]  ;;  %v88_v16 = vld [vmem:[#allocation2] sm:$0xff] }
  0x19   :  { %v163_v17 = vld [vmem:[#allocation7 + $0x78] sm:$0xff]  ;;  %v162_v18 = vld [vmem:[#allocation7 + $0x70] sm:$0xff]  ;;  %v161_v19 = vld [vmem:[#allocation7 + $0x68] sm:$0xff] }
  0x1a   :  { %112 = vmatpush.msra.mxu0 %v101_v3  ;;  %168 = vmatpush.msra.mxu1 %v163_v17  ;;  %v160_v20 = vld [vmem:[#allocation7 + $0x60] sm:$0xff]  ;;  %v159_v21 = vld [vmem:[#allocation7 + $0x58] sm:$0xff]  ;;  %v158_v22 = vld [vmem:[#allocation7 + $0x50] sm:$0xff] }
  0x1b   :  { %v157_v23 = vld [vmem:[#allocation7 + $0x48] sm:$0xff]  ;;  %v156_v24 = vld [vmem:[#allocation7 + $0x40] sm:$0xff]  ;;  %v155_v25 = vld [vmem:[#allocation7 + $0x38] sm:$0xff] }
  0x1c   :  { %113 = vmatpush.msra.mxu0 %v100_v4  ;;  %169 = vmatpush.msra.mxu1 %v162_v18  ;;  %v154_v26 = vld [vmem:[#allocation7 + $0x30] sm:$0xff]  ;;  %v153_v27 = vld [vmem:[#allocation7 + $0x28] sm:$0xff]  ;;  %v152_v28 = vld [vmem:[#allocation7 + $0x20] sm:$0xff] }
  0x1d   :  { %v151_v29 = vld [vmem:[#allocation7 + $0x18] sm:$0xff]  ;;  %v150_v30 = vld [vmem:[#allocation7 + $0x10] sm:$0xff]  ;;  %v149_v31 = vld [vmem:[#allocation7 + $0x8] sm:$0xff] }
  0x1e   :  { %114 = vmatpush.msra.mxu0 %v99_v5  ;;  %170 = vmatpush.msra.mxu1 %v161_v19  ;;  %v148_v32 = vld [vmem:[#allocation7] sm:$0xff]  ;;  %v276_v33 = vld [vmem:[%s488_s2] ss:$0 sm:$0xff]  ;;  %v221_v50 = vld [vmem:[#allocation8 + $0x70] sm:$0xff] }
  0x1f   :  { %v222_v49 = vld [vmem:[#allocation8 + $0x78] sm:$0xff]  ;;  %v220_v51 = vld [vmem:[#allocation8 + $0x68] sm:$0xff]  ;;  %v219_v52 = vld [vmem:[#allocation8 + $0x60] sm:$0xff] }
  0x20   :  { %115 = vmatpush.msra.mxu0 %v98_v6  ;;  %171 = vmatpush.msra.mxu1 %v160_v20  ;;  %v218_v53 = vld [vmem:[#allocation8 + $0x58] sm:$0xff]  ;;  %v217_v54 = vld [vmem:[#allocation8 + $0x50] sm:$0xff]  ;;  %v216_v55 = vld [vmem:[#allocation8 + $0x48] sm:$0xff] }
  0x21   :  { %227 = vmatpush.msra.mxu2 %v222_v49  ;;  %v215_v56 = vld [vmem:[#allocation8 + $0x40] sm:$0xff]  ;;  %v214_v57 = vld [vmem:[#allocation8 + $0x38] sm:$0xff]  ;;  %v213_v58 = vld [vmem:[#allocation8 + $0x30] sm:$0xff] }
  0x22   :  { %116 = vmatpush.msra.mxu0 %v97_v7  ;;  %172 = vmatpush.msra.mxu1 %v159_v21  ;;  %v212_v59 = vld [vmem:[#allocation8 + $0x28] sm:$0xff]  ;;  %v211_v60 = vld [vmem:[#allocation8 + $0x20] sm:$0xff]  ;;  %v210_v61 = vld [vmem:[#allocation8 + $0x18] sm:$0xff] }
  0x23   :  { %228 = vmatpush.msra.mxu2 %v221_v50  ;;  %v209_v62 = vld [vmem:[#allocation8 + $0x10] sm:$0xff]  ;;  %v208_v63 = vld [vmem:[#allocation8 + $0x8] sm:$0xff]  ;;  %v207_v0 = vld [vmem:[#allocation8] sm:$0xff] }
  0x24   :  { %117 = vmatpush.msra.mxu0 %v96_v8  ;;  %173 = vmatpush.msra.mxu1 %v158_v22  ;;  %v277_v1 = vld [vmem:[%s490_s4] ss:$0 sm:$0xff] }
  0x25   :  { %229 = vmatpush.msra.mxu2 %v220_v51  ;;  %v278_v17 = vld [vmem:[%s492_s6] ss:$0 sm:$0xff] }
  0x26   :  { %118 = vmatpush.msra.mxu0 %v95_v9  ;;  %174 = vmatpush.msra.mxu1 %v157_v23 }
  0x27   :  { %230 = vmatpush.msra.mxu2 %v219_v52 }
  0x28   :  { %119 = vmatpush.msra.mxu0 %v94_v10  ;;  %175 = vmatpush.msra.mxu1 %v156_v24 }
  0x29   :  { %231 = vmatpush.msra.mxu2 %v218_v53 }
  0x2a   :  { %120 = vmatpush.msra.mxu0 %v93_v11  ;;  %176 = vmatpush.msra.mxu1 %v155_v25 }
  0x2b   :  { %232 = vmatpush.msra.mxu2 %v217_v54 }
  0x2c   :  { %121 = vmatpush.msra.mxu0 %v92_v12  ;;  %177 = vmatpush.msra.mxu1 %v154_v26 }
  0x2d   :  { %233 = vmatpush.msra.mxu2 %v216_v55 }
  0x2e   :  { %122 = vmatpush.msra.mxu0 %v91_v13  ;;  %178 = vmatpush.msra.mxu1 %v153_v27 }
  0x2f   :  { %234 = vmatpush.msra.mxu2 %v215_v56 }
  0x30   :  { %123 = vmatpush.msra.mxu0 %v90_v14  ;;  %179 = vmatpush.msra.mxu1 %v152_v28 }
  0x31   :  { %235 = vmatpush.msra.mxu2 %v214_v57 }
  0x32   :  { %124 = vmatpush.msra.mxu0 %v89_v15  ;;  %180 = vmatpush.msra.mxu1 %v151_v29 }
  0x33   :  { %125 = vmatmul.f32.vlgmr.msra.gmra.mxu0 %v88_v16  ;;  %236 = vmatpush.msra.mxu2 %v213_v58 }
  0x34   :  { %181 = vmatpush.msra.mxu1 %v150_v30 }
  0x35   :  { %237 = vmatpush.msra.mxu2 %v212_v59 }
  0x36   :  { %182 = vmatpush.msra.mxu1 %v149_v31 }
  0x37   :  { %238 = vmatpush.msra.mxu2 %v211_v60 }
  0x38   :  { %183 = vmatpush.msra.mxu1 %v148_v32 }
  0x39   :  { %239 = vmatpush.msra.mxu2 %v210_v61 }
  0x3b   :  { %240 = vmatpush.msra.mxu2 %v209_v62 }
  0x3d   :  { %241 = vmatpush.msra.mxu2 %v208_v63 }
  0x3f   :  { %242 = vmatpush.msra.mxu2 %v207_v0 }
  0xb0   :  { %v126_v34 = vpop.f32.mrf.mxu0 }
  0xb1   :  { %v127_v35 = vadd.f32 %v276_v33, %v126_v34 }
  0xb3   :  { %v267_v36 = vmul.f32 -1.442695, %v127_v35 }
  0xb5   :  { %279 = vpow2.f32 %v267_v36 }
  0xbb   :  { %v280_v37 = vpop.eup %279 }
  0xbc   :  { %v132_v38 = vadd.f32 1.0, %v280_v37 }
  0xbe   :  { %281 = vrcp.f32 %v132_v38  ;;  %v144_v42 = vand.u32 2147483648, %v132_v38  ;;  %v142_v44 = vand.u32 2147483647, %v132_v38  ;;  %vm138_vm1 = vweird.f32 %v132_v38 }
  0xc0   :  { %v145_v46 = vor.u32 1.1754944e-38, %v144_v42  ;;  %vm143_vm3 = vcmp.eq.f32.partialorder %v142_v44, 8.507059e+37 }
  0xc4   :  { %v282_v39 = vpop.eup %281 }
  0xc5   :  { %v134_v40 = vmul.f32 %v282_v39, %v132_v38  ;;  %vm139_vm0 = vweird.f32 %v282_v39 }
  0xc6   :  { %vm140_vm2 = vmor %vm138_vm1, %vm139_vm0 }
  0xc7   :  { %v135_v41 = vsub.f32 1.0, %v134_v40 }
  0xc9   :  { %v136_v43 = vmul.f32 %v282_v39, %v135_v41 }
  0xcb   :  { %v137_v45 = vadd.f32 %v282_v39, %v136_v43 }
  0xcd   :  { %v141_v47 = vsel %vm140_vm2, %v282_v39, %v137_v45 }
  0xce   :  { %v146_v48 = vsel %vm143_vm3, %v145_v46, %v141_v47 }
  0xcf   :  { %184 = vmatmul.f32.vlgmr.msra.gmra.mxu1 %v146_v48 }
 0x14c   :  { %v185_v2 = vpop.f32.mrf.mxu1 }
 0x14d   :  { %v186_v3 = vadd.f32 %v277_v1, %v185_v2 }
 0x14f   :  { %v268_v4 = vmul.f32 -1.442695, %v186_v3 }
 0x151   :  { %283 = vpow2.f32 %v268_v4 }
 0x157   :  { %v284_v5 = vpop.eup %283 }
 0x158   :  { %v191_v6 = vadd.f32 1.0, %v284_v5 }
 0x15a   :  { %285 = vrcp.f32 %v191_v6  ;;  %v203_v10 = vand.u32 2147483648, %v191_v6  ;;  %v201_v12 = vand.u32 2147483647, %v191_v6  ;;  %vm197_vm5 = vweird.f32 %v191_v6 }
 0x15c   :  { %v204_v14 = vor.u32 1.1754944e-38, %v203_v10  ;;  %vm202_vm7 = vcmp.eq.f32.partialorder %v201_v12, 8.507059e+37 }
 0x160   :  { %v286_v7 = vpop.eup %285 }
 0x161   :  { %v193_v8 = vmul.f32 %v286_v7, %v191_v6  ;;  %vm198_vm4 = vweird.f32 %v286_v7 }
 0x162   :  { %vm199_vm6 = vmor %vm197_vm5, %vm198_vm4 }
 0x163   :  { %v194_v9 = vsub.f32 1.0, %v193_v8 }
 0x165   :  { %v195_v11 = vmul.f32 %v286_v7, %v194_v9 }
 0x167   :  { %v196_v13 = vadd.f32 %v286_v7, %v195_v11 }
 0x169   :  { %v200_v15 = vsel %vm199_vm6, %v286_v7, %v196_v13 }
 0x16a   :  { %v205_v16 = vsel %vm202_vm7, %v204_v14, %v200_v15 }
 0x16b   :  { %243 = vmatmul.f32.vlgmr.msra.gmra.mxu2 %v205_v16 }
 0x1ee   :  { %v244_v18 = vpop.f32.mrf.mxu2 }
 0x1ef   :  { %v245_v19 = vadd.f32 %v278_v17, %v244_v18 }
 0x1f1   :  { %247 = vst [vmem:[#allocation10] sm:$0xff] %v245_v19 }
 0x1f2   :  { %258 = dma.vmem_to_hbm [thread:$0]  %s254_s24, 128, %s256_s27, [#allocation4]  }
 0x1f3   :  { %413 = dma.done.wait [#allocation4], 128  }
 0x1f4   :  { %414 = vsyncadd [#allocation4], 4294967168 }
 0x1f5   :  { %263 = vsyncpa [#allocation3], 1 }
 0x1f6   :  { %264 = vsyncpa [#allocation6], 1 }
 0x1f7   :  { %265 = vsyncpa [#allocation9], 1 }
 0x1f8   :  { %266 = vsyncpa [#allocation4], 1 }

</bundles_post_ra>
